<compile_context>
chip_gen: v7x
topology: tpu7x:2x2x1
jax: 0.10.0
libtpu: 0.0.40
codegen_flags: <defaults>
</compile_context>

<pallas_src>
import jax
import jax.numpy as jnp
from jax.experimental import pallas as pl
from jax.experimental.pallas import tpu as pltpu

_CP = 128    # lane-padded channel width
_P = 16      # halo rows: >= max dilation (4) and a multiple of the bf16 sublane tile (16)
_NCP = 128   # lane-padded classifier-head width


# ---------------------------------------------------------------------------
# Fused Pallas kernel
# ---------------------------------------------------------------------------
def _tcn_fused_kernel(x_ref, w1_ref, b1_ref, wr1_ref, br1_ref,
                      w2_ref, b2_ref, w3_ref, b3_ref,
                      wfc_ref, bfc_ref, o_ref, xpad_ref):
    """Whole TCNClassifier forward for one batch tile.

      x_ref   : (BT, L, CP)   bf16  channel-padded input (NLC)
      w*_ref  : (3, CP, CP)   bf16  conv taps
      b*_ref  : (1, CP)       f32
      wr1/br1 : (CP, CP) bf16 / (1, CP) f32   1x1 residual conv of block 1
      wfc/bfc : (CP, NCP) bf16 / (1, NCP) f32 final Linear (lane padded)
      o_ref   : (BT, NCP)     f32   lane-padded logits
      xpad_ref: (BT, L+2P, CP) bf16 VMEM scratch: activations + shared zero halo
    """
    BT, L, C = x_ref.shape
    P = (xpad_ref.shape[1] - L) // 2
    M = BT * L

    # Zero only the halo bands; the center is fully overwritten below.  Cheap
    # (2*P rows) and megacore-safe (no program_id==0 guard needed).
    zeros_halo = jnp.zeros((BT, P, C), jnp.bfloat16)
    xpad_ref[:, pl.ds(0, P), :] = zeros_halo
    xpad_ref[:, pl.ds(P + L, P), :] = zeros_halo

    # Place this tile's input in the sublane-aligned center.
    xpad_ref[:, pl.ds(P, L), :] = x_ref[...]

    def dilated_block(w_ref, b_ref, dilation, wres_ref=None, bres_ref=None):
        def tap(k):  # (M, C) bf16 view of the k-th dilated tap
            return xpad_ref[:, pl.ds(P + (k - 1) * dilation, L), :].reshape(M, C)

        # Three K=128 MXU dots accumulated in f32 (no concat / stacked-K staging).
        acc = jnp.dot(tap(0), w_ref[0], preferred_element_type=jnp.float32)
        acc = acc + jnp.dot(tap(1), w_ref[1], preferred_element_type=jnp.float32)
        acc = acc + jnp.dot(tap(2), w_ref[2], preferred_element_type=jnp.float32)
        acc = jnp.maximum(acc + b_ref[...], 0.0)                  # conv bias + ReLU
        # TODO(synk): nn.Dropout(0.2) is identity in eval mode; training-mode
        # dropout (prng + mask) is not implemented.

        xc = xpad_ref[:, pl.ds(P, L), :].reshape(M, C)            # aligned center read
        if wres_ref is not None:                                  # 1x1 conv residual
            res = (jnp.dot(xc, wres_ref[...], preferred_element_type=jnp.float32)
                   + bres_ref[...])
        else:                                                     # identity residual
            res = xc.astype(jnp.float32)
        # Block output back into the aligned center (bf16); next block reads it.
        xpad_ref[:, pl.ds(P, L), :] = (acc + res).astype(jnp.bfloat16).reshape(BT, L, C)

    dilated_block(w1_ref, b1_ref, 1, wr1_ref, br1_ref)
    dilated_block(w2_ref, b2_ref, 2)
    dilated_block(w3_ref, b3_ref, 4)

    # AdaptiveAvgPool1d(1) + Flatten + Linear, fused in the same kernel.
    h = xpad_ref[:, pl.ds(P, L), :].astype(jnp.float32)           # (BT, L, C)
    pooled = jnp.mean(h, axis=1)                                  # (BT, C) f32
    logits = (jnp.dot(pooled.astype(jnp.bfloat16), wfc_ref[...],
                      preferred_element_type=jnp.float32) + bfc_ref[...])
    o_ref[...] = logits.astype(o_ref.dtype)


# ---------------------------------------------------------------------------
# Wrapper: layout, lane padding, batch tiling, single pallas_call
# ---------------------------------------------------------------------------
def _pick_batch_tile(B, L):
    """Largest BT (multiple of 8, dividing B, grid>=2) fitting a ~24 MiB budget."""
    budget = 24 * 1024 * 1024

    def need(bt):
        scratch = bt * (L + 2 * _P) * _CP * 2          # bf16 activation scratch
        xblk = 2 * bt * L * _CP * 2                    # double-buffered input block
        interm = 6 * bt * L * _CP * 4                  # f32 in-kernel temporaries
        return scratch + xblk + interm

    cands = [bt for bt in range(8, B, 8) if B % bt == 0 and need(bt) <= budget]
    return max(cands) if cands else B


def tcn_classifier(x_ncl, params, *, batch_tile=None):
    """x_ncl: (B, C_in, L) like PyTorch -> logits (B, num_classes)."""
    B, Cin, L = x_ncl.shape
    hidden = params["b1_w"].shape[-1]          # 64
    NC = params["fc_w"].shape[-1]

    # NCL -> NLC, bf16, channels zero-padded to the lane width (zero channels
    # multiply zero weight rows so the math is unchanged).
    x = jnp.transpose(x_ncl, (0, 2, 1)).astype(jnp.bfloat16)
    x = jnp.pad(x, ((0, 0), (0, 0), (0, _CP - Cin)))

    def pad_conv_w(w):                         # (3, ci, co) -> (3, CP, CP) bf16
        return jnp.pad(w, ((0, 0), (0, _CP - w.shape[1]),
                           (0, _CP - w.shape[2]))).astype(jnp.bfloat16)

    def pad_bias(b):                           # (c,) -> (1, CP) f32
        return jnp.pad(b, (0, _CP - b.shape[0])).reshape(1, _CP).astype(jnp.float32)

    w1, b1 = pad_conv_w(params["b1_w"]), pad_bias(params["b1_b"])
    wr1 = jnp.pad(params["b1_rw"],
                  ((0, _CP - Cin), (0, _CP - hidden))).astype(jnp.bfloat16)
    br1 = pad_bias(params["b1_rb"])
    w2, b2 = pad_conv_w(params["b2_w"]), pad_bias(params["b2_b"])
    w3, b3 = pad_conv_w(params["b3_w"]), pad_bias(params["b3_b"])
    wfc = jnp.pad(params["fc_w"],
                  ((0, _CP - hidden), (0, _NCP - NC))).astype(jnp.bfloat16)   # (CP, NCP)
    bfc = jnp.pad(params["fc_b"], (0, _NCP - NC)).reshape(1, _NCP).astype(jnp.float32)

    if batch_tile is None:
        BT = _pick_batch_tile(B, L)
    else:
        BT = int(batch_tile)
        if B % BT != 0 or (BT != B and BT % 8 != 0):
            raise ValueError(
                f"batch_tile={BT} must divide B={B} and be a multiple of 8 (or == B)")
    grid = (B // BT,)

    # Explicit VMEM budget -> vmem_limit_bytes (default scoped limit is only
    # 16/32 MiB depending on generation).
    weight_bytes = sum(int(a.size) * a.dtype.itemsize
                       for a in (w1, b1, wr1, br1, w2, b2, w3, b3, wfc, bfc))
    est = (BT * (L + 2 * _P) * _CP * 2          # activation scratch
           + 2 * BT * L * _CP * 2               # double-buffered x block
           + 2 * weight_bytes                   # double-buffered weights/biases
           + 2 * BT * _NCP * 4                  # double-buffered logits block
           + 8 * BT * L * _CP * 4)              # f32 in-kernel temporaries headroom
    vmem_limit = int(min(96 * 2 ** 20, max(32 * 2 ** 20, int(est * 1.5) + (4 << 20))))

    c3 = lambda i: (0, 0, 0)
    c2 = lambda i: (0, 0)
    in_specs = [
        pl.BlockSpec((BT, L, _CP), lambda i: (i, 0, 0)),   # x
        pl.BlockSpec((3, _CP, _CP), c3),                   # w1
        pl.BlockSpec((1, _CP), c2),                        # b1
        pl.BlockSpec((_CP, _CP), c2),                      # wr1
        pl.BlockSpec((1, _CP), c2),                        # br1
        pl.BlockSpec((3, _CP, _CP), c3),                   # w2
        pl.BlockSpec((1, _CP), c2),                        # b2
        pl.BlockSpec((3, _CP, _CP), c3),                   # w3
        pl.BlockSpec((1, _CP), c2),                        # b3
        pl.BlockSpec((_CP, _NCP), c2),                     # wfc
        pl.BlockSpec((1, _NCP), c2),                       # bfc
    ]

    out = pl.pallas_call(
        _tcn_fused_kernel,
        out_shape=jax.ShapeDtypeStruct((B, _NCP), jnp.float32),
        grid=grid,
        in_specs=in_specs,
        out_specs=pl.BlockSpec((BT, _NCP), lambda i: (i, 0)),
        scratch_shapes=[pltpu.VMEM((BT, L + 2 * _P, _CP), jnp.bfloat16)],
        compiler_params=pltpu.CompilerParams(
            dimension_semantics=("parallel",),
            vmem_limit_bytes=vmem_limit),
    )(x, w1, b1, wr1, br1, w2, b2, w3, b3, wfc, bfc)

    return out[:, :NC]


# ---------------------------------------------------------------------------
# Deterministic parameter init (shapes from TCNClassifier.__init__)
# ---------------------------------------------------------------------------
def init_params(key, input_size=99, num_classes=2):
    ks = jax.random.split(key, 10)

    def conv_w(k, kk, cin, cout):
        scale = 1.0 / jnp.sqrt(jnp.float32(cin * kk))
        # stored as (kernel_size, C_in, C_out) for the matmul formulation
        return scale * jax.random.normal(k, (kk, cin, cout), jnp.float32)

    return {
        "b1_w":  conv_w(ks[0], 3, input_size, 64),
        "b1_b":  0.01 * jax.random.normal(ks[1], (64,), jnp.float32),
        "b1_rw": conv_w(ks[2], 1, input_size, 64)[0],               # 1x1 residual conv
        "b1_rb": 0.01 * jax.random.normal(ks[3], (64,), jnp.float32),
        "b2_w":  conv_w(ks[4], 3, 64, 64),
        "b2_b":  0.01 * jax.random.normal(ks[5], (64,), jnp.float32),
        "b3_w":  conv_w(ks[6], 3, 64, 64),
        "b3_b":  0.01 * jax.random.normal(ks[7], (64,), jnp.float32),
        "fc_w":  0.1 * jax.random.normal(ks[8], (64, num_classes), jnp.float32),
        "fc_b":  0.01 * jax.random.normal(ks[9], (num_classes,), jnp.float32),
    }


# ---------------------------------------------------------------------------
# Pure-JAX reference (mirrors the kernel's bf16 rounding, f32 accumulation)
# ---------------------------------------------------------------------------
def _ref_forward(x_ncl, p):
    bf = jnp.bfloat16

    def block(h, w, b, wres=None, bres=None, *, dilation):
        B, L, _ = h.shape
        hpad = jnp.pad(h, ((0, 0), (dilation, dilation), (0, 0)))
        acc = jnp.zeros((B, L, w.shape[-1]), jnp.float32)
        for k in range(3):
            acc = acc + jnp.einsum("blc,cd->bld",
                                   hpad[:, k * dilation:k * dilation + L, :],
                                   w[k].astype(bf),
                                   preferred_element_type=jnp.float32)
        acc = jnp.maximum(acc + b, 0.0)
        if wres is None:
            res = h.astype(jnp.float32)
        else:
            res = jnp.einsum("blc,cd->bld", h, wres.astype(bf),
                             preferred_element_type=jnp.float32) + bres
        return (acc + res).astype(bf)

    h = jnp.transpose(x_ncl, (0, 2, 1)).astype(bf)
    h = block(h, p["b1_w"], p["b1_b"], p["b1_rw"], p["b1_rb"], dilation=1)
    h = block(h, p["b2_w"], p["b2_b"], dilation=2)
    h = block(h, p["b3_w"], p["b3_b"], dilation=4)
    pooled = jnp.mean(h.astype(jnp.float32), axis=1)
    return (jnp.dot(pooled.astype(bf), p["fc_w"].astype(bf),
                    preferred_element_type=jnp.float32) + p["fc_b"])


if __name__ == "__main__":
    key = jax.random.PRNGKey(0)
    pkey, xkey = jax.random.split(key)

    INPUT_SIZE, NUM_CLASSES = 99, 2
    B, L = 2, 16
    params = init_params(pkey, input_size=INPUT_SIZE, num_classes=NUM_CLASSES)
    x = jax.random.normal(xkey, (B, INPUT_SIZE, L), jnp.float32)     # PyTorch NCL

    out = jax.jit(tcn_classifier)(x, params)
    out = jax.block_until_ready(out)

    ref = _ref_forward(x, params)
    assert out.shape == (B, NUM_CLASSES)
    assert jnp.allclose(out, ref, atol=5e-3, rtol=5e-3), (out, ref)
    print("KERNEL_OK")
</pallas_src>

<mosaic_0001>
module attributes {stable_mosaic.version = 11 : i64} {
  func.func @_tcn_fused_kernel(%arg0: i32, %arg1: memref<2x16x128xbf16, #tpu.memory_space<vmem>>, %arg2: memref<3x128x128xbf16, #tpu.memory_space<vmem>>, %arg3: memref<1x128xf32, #tpu.memory_space<vmem>>, %arg4: memref<128x128xbf16, #tpu.memory_space<vmem>>, %arg5: memref<1x128xf32, #tpu.memory_space<vmem>>, %arg6: memref<3x128x128xbf16, #tpu.memory_space<vmem>>, %arg7: memref<1x128xf32, #tpu.memory_space<vmem>>, %arg8: memref<3x128x128xbf16, #tpu.memory_space<vmem>>, %arg9: memref<1x128xf32, #tpu.memory_space<vmem>>, %arg10: memref<128x128xbf16, #tpu.memory_space<vmem>>, %arg11: memref<1x128xf32, #tpu.memory_space<vmem>>, %arg12: memref<2x128xf32, #tpu.memory_space<vmem>>, %arg13: memref<2x48x128xbf16, #tpu.memory_space<vmem>>) attributes {dimension_semantics = [#tpu.dimension_semantics<parallel>], iteration_bounds = array<i64: 1>, scalar_prefetch = 0 : i64, scratch_operands = 1 : i64, tpu.core_type = #tpu.core_type<tc>, window_params = [{transform_indices = @transform_0, window_bounds = array<i64: 2, 16, 128>}, {pipeline_mode = #tpu.pipeline_mode<synchronous>, transform_indices = @transform_1, window_bounds = array<i64: 3, 128, 128>}, {pipeline_mode = #tpu.pipeline_mode<synchronous>, transform_indices = @transform_2, window_bounds = array<i64: 1, 128>}, {pipeline_mode = #tpu.pipeline_mode<synchronous>, transform_indices = @transform_3, window_bounds = array<i64: 128, 128>}, {pipeline_mode = #tpu.pipeline_mode<synchronous>, transform_indices = @transform_4, window_bounds = array<i64: 1, 128>}, {pipeline_mode = #tpu.pipeline_mode<synchronous>, transform_indices = @transform_5, window_bounds = array<i64: 3, 128, 128>}, {pipeline_mode = #tpu.pipeline_mode<synchronous>, transform_indices = @transform_6, window_bounds = array<i64: 1, 128>}, {pipeline_mode = #tpu.pipeline_mode<synchronous>, transform_indices = @transform_7, window_bounds = array<i64: 3, 128, 128>}, {pipeline_mode = #tpu.pipeline_mode<synchronous>, transform_indices = @transform_8, window_bounds = array<i64: 1, 128>}, {pipeline_mode = #tpu.pipeline_mode<synchronous>, transform_indices = @transform_9, window_bounds = array<i64: 128, 128>}, {pipeline_mode = #tpu.pipeline_mode<synchronous>, transform_indices = @transform_10, window_bounds = array<i64: 1, 128>}, {transform_indices = @transform_11, window_bounds = array<i64: 2, 128>}]} {
    %cst = arith.constant 0.000000e+00 : bf16
    %0 = vector.broadcast %cst : bf16 to vector<2x16x128xbf16>
    %c0 = arith.constant 0 : index
    %c0_0 = arith.constant 0 : index
    %c0_1 = arith.constant 0 : index
    %1 = vector.load %arg13[%c0, %c0_0, %c0_1] : memref<2x48x128xbf16, #tpu.memory_space<vmem>>, vector<2x16x128xbf16>
    tpu.vector_store %arg13[%c0, %c0_0, %c0_1], %0 {strides = array<i32>} : memref<2x48x128xbf16, #tpu.memory_space<vmem>>, vector<2x16x128xbf16>,
    %c0_2 = arith.constant 0 : index
    %c32 = arith.constant 32 : index
    %c0_3 = arith.constant 0 : index
    %2 = vector.load %arg13[%c0_2, %c32, %c0_3] : memref<2x48x128xbf16, #tpu.memory_space<vmem>>, vector<2x16x128xbf16>
    tpu.vector_store %arg13[%c0_2, %c32, %c0_3], %0 {strides = array<i32>} : memref<2x48x128xbf16, #tpu.memory_space<vmem>>, vector<2x16x128xbf16>,
    %c0_4 = arith.constant 0 : index
    %c0_5 = arith.constant 0 : index
    %c0_6 = arith.constant 0 : index
    %3 = vector.load %arg1[%c0_4, %c0_5, %c0_6] : memref<2x16x128xbf16, #tpu.memory_space<vmem>>, vector<2x16x128xbf16>
    %c0_7 = arith.constant 0 : index
    %c16 = arith.constant 16 : index
    %c0_8 = arith.constant 0 : index
    %4 = vector.load %arg13[%c0_7, %c16, %c0_8] : memref<2x48x128xbf16, #tpu.memory_space<vmem>>, vector<2x16x128xbf16>
    tpu.vector_store %arg13[%c0_7, %c16, %c0_8], %3 {strides = array<i32>} : memref<2x48x128xbf16, #tpu.memory_space<vmem>>, vector<2x16x128xbf16>,
    %c0_9 = arith.constant 0 : index
    %c15 = arith.constant 15 : index
    %c0_10 = arith.constant 0 : index
    %5 = vector.load %arg13[%c0_9, %c15, %c0_10] : memref<2x48x128xbf16, #tpu.memory_space<vmem>>, vector<2x16x128xbf16>
    %6 = vector.shape_cast %5 : vector<2x16x128xbf16> to vector<32x128xbf16>
    %c0_11 = arith.constant 0 : index
    %c0_12 = arith.constant 0 : index
    %c0_13 = arith.constant 0 : index
    %7 = vector.load %arg2[%c0_11, %c0_12, %c0_13] : memref<3x128x128xbf16, #tpu.memory_space<vmem>>, vector<1x128x128xbf16>
    %8 = vector.shape_cast %7 : vector<1x128x128xbf16> to vector<128x128xbf16>
    %cst_14 = arith.constant dense<0.000000e+00> : vector<32x128xf32>
    %9 = tpu.matmul %6, %8, %cst_14 {dimension_numbers = #tpu.dot_dimension_numbers<[1], [0], [0], [1], [0, 0, 1, 1], [], []>} : vector<32x128xbf16>, vector<128x128xbf16>, vector<32x128xf32> -> vector<32x128xf32>
    %c0_15 = arith.constant 0 : index
    %c16_16 = arith.constant 16 : index
    %c0_17 = arith.constant 0 : index
    %10 = vector.load %arg13[%c0_15, %c16_16, %c0_17] : memref<2x48x128xbf16, #tpu.memory_space<vmem>>, vector<2x16x128xbf16>
    %11 = vector.shape_cast %10 : vector<2x16x128xbf16> to vector<32x128xbf16>
    %c1 = arith.constant 1 : index
    %c0_18 = arith.constant 0 : index
    %c0_19 = arith.constant 0 : index
    %12 = vector.load %arg2[%c1, %c0_18, %c0_19] : memref<3x128x128xbf16, #tpu.memory_space<vmem>>, vector<1x128x128xbf16>
    %13 = vector.shape_cast %12 : vector<1x128x128xbf16> to vector<128x128xbf16>
    %cst_20 = arith.constant dense<0.000000e+00> : vector<32x128xf32>
    %14 = tpu.matmul %11, %13, %cst_20 {dimension_numbers = #tpu.dot_dimension_numbers<[1], [0], [0], [1], [0, 0, 1, 1], [], []>} : vector<32x128xbf16>, vector<128x128xbf16>, vector<32x128xf32> -> vector<32x128xf32>
    %15 = arith.addf %9, %14 : vector<32x128xf32>
    %c0_21 = arith.constant 0 : index
    %c17 = arith.constant 17 : index
    %c0_22 = arith.constant 0 : index
    %16 = vector.load %arg13[%c0_21, %c17, %c0_22] : memref<2x48x128xbf16, #tpu.memory_space<vmem>>, vector<2x16x128xbf16>
    %17 = vector.shape_cast %16 : vector<2x16x128xbf16> to vector<32x128xbf16>
    %c2 = arith.constant 2 : index
    %c0_23 = arith.constant 0 : index
    %c0_24 = arith.constant 0 : index
    %18 = vector.load %arg2[%c2, %c0_23, %c0_24] : memref<3x128x128xbf16, #tpu.memory_space<vmem>>, vector<1x128x128xbf16>
    %19 = vector.shape_cast %18 : vector<1x128x128xbf16> to vector<128x128xbf16>
    %cst_25 = arith.constant dense<0.000000e+00> : vector<32x128xf32>
    %20 = tpu.matmul %17, %19, %cst_25 {dimension_numbers = #tpu.dot_dimension_numbers<[1], [0], [0], [1], [0, 0, 1, 1], [], []>} : vector<32x128xbf16>, vector<128x128xbf16>, vector<32x128xf32> -> vector<32x128xf32>
    %21 = arith.addf %15, %20 : vector<32x128xf32>
    %c0_26 = arith.constant 0 : index
    %c0_27 = arith.constant 0 : index
    %22 = vector.load %arg3[%c0_26, %c0_27] : memref<1x128xf32, #tpu.memory_space<vmem>>, vector<1x128xf32>
    %23 = vector.broadcast %22 : vector<1x128xf32> to vector<32x128xf32>
    %24 = arith.addf %21, %23 : vector<32x128xf32>
    %cst_28 = arith.constant 0.000000e+00 : f32
    %25 = vector.broadcast %cst_28 : f32 to vector<32x128xf32>
    %26 = arith.maximumf %24, %25 : vector<32x128xf32>
    %c0_29 = arith.constant 0 : index
    %c16_30 = arith.constant 16 : index
    %c0_31 = arith.constant 0 : index
    %27 = vector.load %arg13[%c0_29, %c16_30, %c0_31] : memref<2x48x128xbf16, #tpu.memory_space<vmem>>, vector<2x16x128xbf16>
    %28 = vector.shape_cast %27 : vector<2x16x128xbf16> to vector<32x128xbf16>
    %c0_32 = arith.constant 0 : index
    %c0_33 = arith.constant 0 : index
    %29 = vector.load %arg4[%c0_32, %c0_33] : memref<128x128xbf16, #tpu.memory_space<vmem>>, vector<128x128xbf16>
    %cst_34 = arith.constant dense<0.000000e+00> : vector<32x128xf32>
    %30 = tpu.matmul %28, %29, %cst_34 {dimension_numbers = #tpu.dot_dimension_numbers<[1], [0], [0], [1], [0, 0, 1, 1], [], []>} : vector<32x128xbf16>, vector<128x128xbf16>, vector<32x128xf32> -> vector<32x128xf32>
    %c0_35 = arith.constant 0 : index
    %c0_36 = arith.constant 0 : index
    %31 = vector.load %arg5[%c0_35, %c0_36] : memref<1x128xf32, #tpu.memory_space<vmem>>, vector<1x128xf32>
    %32 = vector.broadcast %31 : vector<1x128xf32> to vector<32x128xf32>
    %33 = arith.addf %30, %32 : vector<32x128xf32>
    %34 = arith.addf %26, %33 : vector<32x128xf32>
    %35 = arith.truncf %34 : vector<32x128xf32> to vector<32x128xbf16>
    %36 = vector.shape_cast %35 : vector<32x128xbf16> to vector<2x16x128xbf16>
    %c0_37 = arith.constant 0 : index
    %c16_38 = arith.constant 16 : index
    %c0_39 = arith.constant 0 : index
    %37 = vector.load %arg13[%c0_37, %c16_38, %c0_39] : memref<2x48x128xbf16, #tpu.memory_space<vmem>>, vector<2x16x128xbf16>
    tpu.vector_store %arg13[%c0_37, %c16_38, %c0_39], %36 {strides = array<i32>} : memref<2x48x128xbf16, #tpu.memory_space<vmem>>, vector<2x16x128xbf16>,
    %c0_40 = arith.constant 0 : index
    %c14 = arith.constant 14 : index
    %c0_41 = arith.constant 0 : index
    %38 = vector.load %arg13[%c0_40, %c14, %c0_41] : memref<2x48x128xbf16, #tpu.memory_space<vmem>>, vector<2x16x128xbf16>
    %39 = vector.shape_cast %38 : vector<2x16x128xbf16> to vector<32x128xbf16>
    %c0_42 = arith.constant 0 : index
    %c0_43 = arith.constant 0 : index
    %c0_44 = arith.constant 0 : index
    %40 = vector.load %arg6[%c0_42, %c0_43, %c0_44] : memref<3x128x128xbf16, #tpu.memory_space<vmem>>, vector<1x128x128xbf16>
    %41 = vector.shape_cast %40 : vector<1x128x128xbf16> to vector<128x128xbf16>
    %cst_45 = arith.constant dense<0.000000e+00> : vector<32x128xf32>
    %42 = tpu.matmul %39, %41, %cst_45 {dimension_numbers = #tpu.dot_dimension_numbers<[1], [0], [0], [1], [0, 0, 1, 1], [], []>} : vector<32x128xbf16>, vector<128x128xbf16>, vector<32x128xf32> -> vector<32x128xf32>
    %c0_46 = arith.constant 0 : index
    %c16_47 = arith.constant 16 : index
    %c0_48 = arith.constant 0 : index
    %43 = vector.load %arg13[%c0_46, %c16_47, %c0_48] : memref<2x48x128xbf16, #tpu.memory_space<vmem>>, vector<2x16x128xbf16>
    %44 = vector.shape_cast %43 : vector<2x16x128xbf16> to vector<32x128xbf16>
    %c1_49 = arith.constant 1 : index
    %c0_50 = arith.constant 0 : index
    %c0_51 = arith.constant 0 : index
    %45 = vector.load %arg6[%c1_49, %c0_50, %c0_51] : memref<3x128x128xbf16, #tpu.memory_space<vmem>>, vector<1x128x128xbf16>
    %46 = vector.shape_cast %45 : vector<1x128x128xbf16> to vector<128x128xbf16>
    %cst_52 = arith.constant dense<0.000000e+00> : vector<32x128xf32>
    %47 = tpu.matmul %44, %46, %cst_52 {dimension_numbers = #tpu.dot_dimension_numbers<[1], [0], [0], [1], [0, 0, 1, 1], [], []>} : vector<32x128xbf16>, vector<128x128xbf16>, vector<32x128xf32> -> vector<32x128xf32>
    %48 = arith.addf %42, %47 : vector<32x128xf32>
    %c0_53 = arith.constant 0 : index
    %c18 = arith.constant 18 : index
    %c0_54 = arith.constant 0 : index
    %49 = vector.load %arg13[%c0_53, %c18, %c0_54] : memref<2x48x128xbf16, #tpu.memory_space<vmem>>, vector<2x16x128xbf16>
    %50 = vector.shape_cast %49 : vector<2x16x128xbf16> to vector<32x128xbf16>
    %c2_55 = arith.constant 2 : index
    %c0_56 = arith.constant 0 : index
    %c0_57 = arith.constant 0 : index
    %51 = vector.load %arg6[%c2_55, %c0_56, %c0_57] : memref<3x128x128xbf16, #tpu.memory_space<vmem>>, vector<1x128x128xbf16>
    %52 = vector.shape_cast %51 : vector<1x128x128xbf16> to vector<128x128xbf16>
    %cst_58 = arith.constant dense<0.000000e+00> : vector<32x128xf32>
    %53 = tpu.matmul %50, %52, %cst_58 {dimension_numbers = #tpu.dot_dimension_numbers<[1], [0], [0], [1], [0, 0, 1, 1], [], []>} : vector<32x128xbf16>, vector<128x128xbf16>, vector<32x128xf32> -> vector<32x128xf32>
    %54 = arith.addf %48, %53 : vector<32x128xf32>
    %c0_59 = arith.constant 0 : index
    %c0_60 = arith.constant 0 : index
    %55 = vector.load %arg7[%c0_59, %c0_60] : memref<1x128xf32, #tpu.memory_space<vmem>>, vector<1x128xf32>
    %56 = vector.broadcast %55 : vector<1x128xf32> to vector<32x128xf32>
    %57 = arith.addf %54, %56 : vector<32x128xf32>
    %cst_61 = arith.constant 0.000000e+00 : f32
    %58 = vector.broadcast %cst_61 : f32 to vector<32x128xf32>
    %59 = arith.maximumf %57, %58 : vector<32x128xf32>
    %c0_62 = arith.constant 0 : index
    %c16_63 = arith.constant 16 : index
    %c0_64 = arith.constant 0 : index
    %60 = vector.load %arg13[%c0_62, %c16_63, %c0_64] : memref<2x48x128xbf16, #tpu.memory_space<vmem>>, vector<2x16x128xbf16>
    %61 = vector.shape_cast %60 : vector<2x16x128xbf16> to vector<32x128xbf16>
    %62 = arith.extf %61 : vector<32x128xbf16> to vector<32x128xf32>
    %63 = arith.addf %59, %62 : vector<32x128xf32>
    %64 = arith.truncf %63 : vector<32x128xf32> to vector<32x128xbf16>
    %65 = vector.shape_cast %64 : vector<32x128xbf16> to vector<2x16x128xbf16>
    %c0_65 = arith.constant 0 : index
    %c16_66 = arith.constant 16 : index
    %c0_67 = arith.constant 0 : index
    %66 = vector.load %arg13[%c0_65, %c16_66, %c0_67] : memref<2x48x128xbf16, #tpu.memory_space<vmem>>, vector<2x16x128xbf16>
    tpu.vector_store %arg13[%c0_65, %c16_66, %c0_67], %65 {strides = array<i32>} : memref<2x48x128xbf16, #tpu.memory_space<vmem>>, vector<2x16x128xbf16>,
    %c0_68 = arith.constant 0 : index
    %c12 = arith.constant 12 : index
    %c0_69 = arith.constant 0 : index
    %67 = vector.load %arg13[%c0_68, %c12, %c0_69] : memref<2x48x128xbf16, #tpu.memory_space<vmem>>, vector<2x16x128xbf16>
    %68 = vector.shape_cast %67 : vector<2x16x128xbf16> to vector<32x128xbf16>
    %c0_70 = arith.constant 0 : index
    %c0_71 = arith.constant 0 : index
    %c0_72 = arith.constant 0 : index
    %69 = vector.load %arg8[%c0_70, %c0_71, %c0_72] : memref<3x128x128xbf16, #tpu.memory_space<vmem>>, vector<1x128x128xbf16>
    %70 = vector.shape_cast %69 : vector<1x128x128xbf16> to vector<128x128xbf16>
    %cst_73 = arith.constant dense<0.000000e+00> : vector<32x128xf32>
    %71 = tpu.matmul %68, %70, %cst_73 {dimension_numbers = #tpu.dot_dimension_numbers<[1], [0], [0], [1], [0, 0, 1, 1], [], []>} : vector<32x128xbf16>, vector<128x128xbf16>, vector<32x128xf32> -> vector<32x128xf32>
    %c0_74 = arith.constant 0 : index
    %c16_75 = arith.constant 16 : index
    %c0_76 = arith.constant 0 : index
    %72 = vector.load %arg13[%c0_74, %c16_75, %c0_76] : memref<2x48x128xbf16, #tpu.memory_space<vmem>>, vector<2x16x128xbf16>
    %73 = vector.shape_cast %72 : vector<2x16x128xbf16> to vector<32x128xbf16>
    %c1_77 = arith.constant 1 : index
    %c0_78 = arith.constant 0 : index
    %c0_79 = arith.constant 0 : index
    %74 = vector.load %arg8[%c1_77, %c0_78, %c0_79] : memref<3x128x128xbf16, #tpu.memory_space<vmem>>, vector<1x128x128xbf16>
    %75 = vector.shape_cast %74 : vector<1x128x128xbf16> to vector<128x128xbf16>
    %cst_80 = arith.constant dense<0.000000e+00> : vector<32x128xf32>
    %76 = tpu.matmul %73, %75, %cst_80 {dimension_numbers = #tpu.dot_dimension_numbers<[1], [0], [0], [1], [0, 0, 1, 1], [], []>} : vector<32x128xbf16>, vector<128x128xbf16>, vector<32x128xf32> -> vector<32x128xf32>
    %77 = arith.addf %71, %76 : vector<32x128xf32>
    %c0_81 = arith.constant 0 : index
    %c20 = arith.constant 20 : index
    %c0_82 = arith.constant 0 : index
    %78 = vector.load %arg13[%c0_81, %c20, %c0_82] : memref<2x48x128xbf16, #tpu.memory_space<vmem>>, vector<2x16x128xbf16>
    %79 = vector.shape_cast %78 : vector<2x16x128xbf16> to vector<32x128xbf16>
    %c2_83 = arith.constant 2 : index
    %c0_84 = arith.constant 0 : index
    %c0_85 = arith.constant 0 : index
    %80 = vector.load %arg8[%c2_83, %c0_84, %c0_85] : memref<3x128x128xbf16, #tpu.memory_space<vmem>>, vector<1x128x128xbf16>
    %81 = vector.shape_cast %80 : vector<1x128x128xbf16> to vector<128x128xbf16>
    %cst_86 = arith.constant dense<0.000000e+00> : vector<32x128xf32>
    %82 = tpu.matmul %79, %81, %cst_86 {dimension_numbers = #tpu.dot_dimension_numbers<[1], [0], [0], [1], [0, 0, 1, 1], [], []>} : vector<32x128xbf16>, vector<128x128xbf16>, vector<32x128xf32> -> vector<32x128xf32>
    %83 = arith.addf %77, %82 : vector<32x128xf32>
    %c0_87 = arith.constant 0 : index
    %c0_88 = arith.constant 0 : index
    %84 = vector.load %arg9[%c0_87, %c0_88] : memref<1x128xf32, #tpu.memory_space<vmem>>, vector<1x128xf32>
    %85 = vector.broadcast %84 : vector<1x128xf32> to vector<32x128xf32>
    %86 = arith.addf %83, %85 : vector<32x128xf32>
    %cst_89 = arith.constant 0.000000e+00 : f32
    %87 = vector.broadcast %cst_89 : f32 to vector<32x128xf32>
    %88 = arith.maximumf %86, %87 : vector<32x128xf32>
    %c0_90 = arith.constant 0 : index
    %c16_91 = arith.constant 16 : index
    %c0_92 = arith.constant 0 : index
    %89 = vector.load %arg13[%c0_90, %c16_91, %c0_92] : memref<2x48x128xbf16, #tpu.memory_space<vmem>>, vector<2x16x128xbf16>
    %90 = vector.shape_cast %89 : vector<2x16x128xbf16> to vector<32x128xbf16>
    %91 = arith.extf %90 : vector<32x128xbf16> to vector<32x128xf32>
    %92 = arith.addf %88, %91 : vector<32x128xf32>
    %93 = arith.truncf %92 : vector<32x128xf32> to vector<32x128xbf16>
    %94 = vector.shape_cast %93 : vector<32x128xbf16> to vector<2x16x128xbf16>
    %c0_93 = arith.constant 0 : index
    %c16_94 = arith.constant 16 : index
    %c0_95 = arith.constant 0 : index
    %95 = vector.load %arg13[%c0_93, %c16_94, %c0_95] : memref<2x48x128xbf16, #tpu.memory_space<vmem>>, vector<2x16x128xbf16>
    tpu.vector_store %arg13[%c0_93, %c16_94, %c0_95], %94 {strides = array<i32>} : memref<2x48x128xbf16, #tpu.memory_space<vmem>>, vector<2x16x128xbf16>,
    %c0_96 = arith.constant 0 : index
    %c16_97 = arith.constant 16 : index
    %c0_98 = arith.constant 0 : index
    %96 = vector.load %arg13[%c0_96, %c16_97, %c0_98] : memref<2x48x128xbf16, #tpu.memory_space<vmem>>, vector<2x16x128xbf16>
    %97 = arith.extf %96 : vector<2x16x128xbf16> to vector<2x16x128xf32>
    %cst_99 = arith.constant dense<0.000000e+00> : vector<2x128xf32>
    %98 = vector.multi_reduction <add>, %97, %cst_99 [1] : vector<2x16x128xf32> to vector<2x128xf32>
    %cst_100 = arith.constant 1.600000e+01 : f32
    %99 = vector.broadcast %cst_100 : f32 to vector<2x128xf32>
    %100 = arith.divf %98, %99 : vector<2x128xf32>
    %101 = arith.truncf %100 : vector<2x128xf32> to vector<2x128xbf16>
    %c0_101 = arith.constant 0 : index
    %c0_102 = arith.constant 0 : index
    %102 = vector.load %arg10[%c0_101, %c0_102] : memref<128x128xbf16, #tpu.memory_space<vmem>>, vector<128x128xbf16>
    %cst_103 = arith.constant dense<0.000000e+00> : vector<2x128xf32>
    %103 = tpu.matmul %101, %102, %cst_103 {dimension_numbers = #tpu.dot_dimension_numbers<[1], [0], [0], [1], [0, 0, 1, 1], [], []>} : vector<2x128xbf16>, vector<128x128xbf16>, vector<2x128xf32> -> vector<2x128xf32>
    %c0_104 = arith.constant 0 : index
    %c0_105 = arith.constant 0 : index
    %104 = vector.load %arg11[%c0_104, %c0_105] : memref<1x128xf32, #tpu.memory_space<vmem>>, vector<1x128xf32>
    %105 = vector.broadcast %104 : vector<1x128xf32> to vector<2x128xf32>
    %106 = arith.addf %103, %105 : vector<2x128xf32>
    %c0_106 = arith.constant 0 : index
    %c0_107 = arith.constant 0 : index
    %107 = vector.load %arg12[%c0_106, %c0_107] : memref<2x128xf32, #tpu.memory_space<vmem>>, vector<2x128xf32>
    tpu.vector_store %arg12[%c0_106, %c0_107], %106 {strides = array<i32>} : memref<2x128xf32, #tpu.memory_space<vmem>>, vector<2x128xf32>,
    return
  }
  func.func @transform_0(%arg0: i32) -> (i32, i32, i32) {
    %c0_i32 = arith.constant 0 : i32
    %c0_i32_0 = arith.constant 0 : i32
    %c0_i32_1 = arith.constant 0 : i32
    return %arg0, %c0_i32, %c0_i32_0 : i32, i32, i32
  }
  func.func @transform_1(%arg0: i32) -> (i32, i32, i32) {
    %c0_i32 = arith.constant 0 : i32
    %c0_i32_0 = arith.constant 0 : i32
    %c0_i32_1 = arith.constant 0 : i32
    %c0_i32_2 = arith.constant 0 : i32
    return %c0_i32, %c0_i32_0, %c0_i32_1 : i32, i32, i32
  }
  func.func @transform_2(%arg0: i32) -> (i32, i32) {
    %c0_i32 = arith.constant 0 : i32
    %c0_i32_0 = arith.constant 0 : i32
    %c0_i32_1 = arith.constant 0 : i32
    return %c0_i32, %c0_i32_0 : i32, i32
  }
  func.func @transform_3(%arg0: i32) -> (i32, i32) {
    %c0_i32 = arith.constant 0 : i32
    %c0_i32_0 = arith.constant 0 : i32
    %c0_i32_1 = arith.constant 0 : i32
    return %c0_i32, %c0_i32_0 : i32, i32
  }
  func.func @transform_4(%arg0: i32) -> (i32, i32) {
    %c0_i32 = arith.constant 0 : i32
    %c0_i32_0 = arith.constant 0 : i32
    %c0_i32_1 = arith.constant 0 : i32
    return %c0_i32, %c0_i32_0 : i32, i32
  }
  func.func @transform_5(%arg0: i32) -> (i32, i32, i32) {
    %c0_i32 = arith.constant 0 : i32
    %c0_i32_0 = arith.constant 0 : i32
    %c0_i32_1 = arith.constant 0 : i32
    %c0_i32_2 = arith.constant 0 : i32
    return %c0_i32, %c0_i32_0, %c0_i32_1 : i32, i32, i32
  }
  func.func @transform_6(%arg0: i32) -> (i32, i32) {
    %c0_i32 = arith.constant 0 : i32
    %c0_i32_0 = arith.constant 0 : i32
    %c0_i32_1 = arith.constant 0 : i32
    return %c0_i32, %c0_i32_0 : i32, i32
  }
  func.func @transform_7(%arg0: i32) -> (i32, i32, i32) {
    %c0_i32 = arith.constant 0 : i32
    %c0_i32_0 = arith.constant 0 : i32
    %c0_i32_1 = arith.constant 0 : i32
    %c0_i32_2 = arith.constant 0 : i32
    return %c0_i32, %c0_i32_0, %c0_i32_1 : i32, i32, i32
  }
  func.func @transform_8(%arg0: i32) -> (i32, i32) {
    %c0_i32 = arith.constant 0 : i32
    %c0_i32_0 = arith.constant 0 : i32
    %c0_i32_1 = arith.constant 0 : i32
    return %c0_i32, %c0_i32_0 : i32, i32
  }
  func.func @transform_9(%arg0: i32) -> (i32, i32) {
    %c0_i32 = arith.constant 0 : i32
    %c0_i32_0 = arith.constant 0 : i32
    %c0_i32_1 = arith.constant 0 : i32
    return %c0_i32, %c0_i32_0 : i32, i32
  }
  func.func @transform_10(%arg0: i32) -> (i32, i32) {
    %c0_i32 = arith.constant 0 : i32
    %c0_i32_0 = arith.constant 0 : i32
    %c0_i32_1 = arith.constant 0 : i32
    return %c0_i32, %c0_i32_0 : i32, i32
  }
  func.func @transform_11(%arg0: i32) -> (i32, i32) {
    %c0_i32 = arith.constant 0 : i32
    %c0_i32_0 = arith.constant 0 : i32
    return %arg0, %c0_i32 : i32, i32
  }
}

</mosaic_0001>

<bundles_post_ra>
// kernel: tcn_classifier.1
= control target key start
LH: loop header
LB: loop body
LE: loop exit
PB: predicated region body
PF: predicated region fallthrough
CT: control target
= control target key end

     0   :  { %v2249_v2 = vmov 0   ;;  %vm66_vm0 = vsmask.f32 256  ;;  %vm324_vm1 = vsmask.f32 7424  ;;  %s2670_s0 = inlined_call_operand.vmem [shape: bf16[2,16,128], index: 0, kind: input, shape index: {}]   ;;  %s2671_s1 = inlined_call_operand.vmem [shape: bf16[3,128,128], index: 1, kind: input, shape index: {}]   ;;  %s2672_s2 = inlined_call_operand.vmem [shape: f32[1,128], index: 2, kind: input, shape index: {}]   ;;  %s2673_s3 = inlined_call_operand.vmem [shape: bf16[128,128], index: 3, kind: input, shape index: {}]   ;;  %s2674_s4 = inlined_call_operand.vmem [shape: f32[1,128], index: 4, kind: input, shape index: {}]   ;;  %s2675_s5 = inlined_call_operand.vmem [shape: bf16[3,128,128], index: 5, kind: input, shape index: {}]   ;;  %s2676_s6 = inlined_call_operand.vmem [shape: f32[1,128], index: 6, kind: input, shape index: {}]   ;;  %s2677_s7 = inlined_call_operand.vmem [shape: bf16[3,128,128], index: 7, kind: input, shape index: {}]   ;;  %s2678_s8 = inlined_call_operand.vmem [shape: f32[1,128], index: 8, kind: input, shape index: {}]   ;;  %s2679_s9 = inlined_call_operand.vmem [shape: bf16[128,128], index: 9, kind: input, shape index: {}]   ;;  %s2680_s10 = inlined_call_operand.vmem [shape: f32[1,128], index: 10, kind: input, shape index: {}]   ;;  %s2681_s11 = inlined_call_operand.hbm [shape: f32[2,128], index: 11, kind: output, shape index: {}]  }
   0x1   :  { %v2135_v0 = vld [vmem:[%s2671_s1 + $0x40] sm:$0xff]   ;;  %v2136_v1 = vld [vmem:[%s2671_s1 + $0x48] sm:$0xff]   ;;  %40 = vst [vmem:[#allocation2] sm:$0xff] %v2249_v2  ;;  %41 = vst [vmem:[#allocation2 + $0x18] sm:$0xff] %v2249_v2 }
   0x2   :  { %42 = vst [vmem:[#allocation2 + $0x10] sm:$0xff] %v2249_v2  ;;  %43 = vst [vmem:[#allocation2 + $0x28] sm:$0xff] %v2249_v2  ;;  %1887 = vmatprep.subr.bf16.mxu0 %v2135_v0  ;;  %v2137_v3 = vld [vmem:[%s2671_s1 + $0x50] sm:$0xff]   ;;  %v2138_v4 = vld [vmem:[%s2671_s1 + $0x58] sm:$0xff]  }
   0x3   :  { %1888 = vmatpush3.bf16.msra.mxu0 %v2135_v0  ;;  %v2328_v5 = vld [vmem:[%s2670_s0] sm:$0xff]   ;;  %v2140_v7 = vld [vmem:[%s2671_s1 + $0x68] sm:$0xff]   ;;  %v2141_v9 = vld [vmem:[%s2671_s1 + $0x70] sm:$0xff]  }
   0x4   :  { %1889 = vmatprep.subr.bf16.mxu0 %v2136_v1  ;;  %1903 = vmatprep.mubr.bf16.mxu0 %v2328_v5  ;;  %v2139_v6 = vld [vmem:[%s2671_s1 + $0x60] sm:$0xff]   ;;  %v72_v11 = vshrl.u32 %v2328_v5, 16  ;;  %v2155_v12 = vld [vmem:[%s2673_s3 + $0x8] sm:$0xff]   ;;  %v2142_v13 = vld [vmem:[%s2671_s1 + $0x78] sm:$0xff]   ;;  %v75_v14 = vshll.u32 %v2328_v5, 16 }
   0x5   :  { %1963 = vmatprep.mubr.bf16.mxu1 %v2328_v5  ;;  %v2153_v8 = vld [vmem:[%s2673_s3] sm:$0xff]   ;;  %v2157_v15 = vld [vmem:[%s2673_s3 + $0x10] sm:$0xff]   ;;  %v2159_v18 = vld [vmem:[%s2673_s3 + $0x18] sm:$0xff]  }
   0x6   :  { %1947 = vmatprep.subr.bf16.mxu1 %v2153_v8  ;;  %v74_v17 = vrot.slane %v72_v11, 7  ;;  %v2144_v19 = vld [vmem:[%s2671_s1] sm:$0xff]   ;;  %v2366_v20 = vld [vmem:[%s2670_s0 + $0x8] sm:$0xff]   ;;  %v2147_v31 = vld [vmem:[%s2671_s1 + $0x10] sm:$0xff]   ;;  %v330_v38 = vrot.slane %v75_v14, 1 }
   0x7   :  { %1890 = vmatpush3.bf16.msra.mxu0 %v2136_v1  ;;  %1948 = vmatpush3.bf16.msra.mxu1 %v2153_v8  ;;  %v2161_v23 = vld [vmem:[%s2673_s3 + $0x20] sm:$0xff]   ;;  %v2146_v25 = vld [vmem:[%s2671_s1 + $0x8] sm:$0xff]   ;;  %v84_v27 = vshrl.u32 %v2366_v20, 16  ;;  %v87_v34 = vshll.u32 %v2366_v20, 16  ;;  %v2148_v35 = vld [vmem:[%s2671_s1 + $0x18] sm:$0xff]  }
   0x8   :  { %1891 = vmatprep.subr.bf16.mxu0 %v2137_v3  ;;  %v62_v10 = vld [vmem:[#allocation2] sm:$0x80]  ;;  %1949 = vmatprep.subr.bf16.mxu1 %v2155_v12  ;;  %v77_v22 = vor.u32 %v75_v14, %v74_v17  ;;  %v64_v24 = vld [vmem:[#allocation2 + $0x18] sm:$0x80]  ;;  %v2163_v29 = vld [vmem:[%s2673_s3 + $0x28] sm:$0xff]   ;;  %v331_v50 = vor.u32 %v330_v38, %v72_v11 }
   0x9   :  { %v68_v16 = vshrl.u32 %v62_v10, 16  ;;  %v80_v28 = vshrl.u32 %v64_v24, 16  ;;  %v321_v30 = vld [vmem:[#allocation2 + $0x10] sm:$0x1]  ;;  %v86_v33 = vrot.slane %v84_v27, 7  ;;  %v2167_v40 = vld [vmem:[%s2673_s3 + $0x38] sm:$0xff]  }
   0xa   :  { %v333_v32 = vshll.u32 %v321_v30, 16  ;;  %v2165_v37 = vld [vmem:[%s2673_s3 + $0x30] sm:$0xff]   ;;  %v2149_v41 = vld [vmem:[%s2671_s1 + $0x20] sm:$0xff]   ;;  %v2150_v43 = vld [vmem:[%s2671_s1 + $0x28] sm:$0xff]  }
   0xb   :  { %1892 = vmatpush3.bf16.msra.mxu0 %v2137_v3  ;;  %1950 = vmatpush3.bf16.msra.mxu1 %v2155_v12  ;;  %v70_v21 = vrot.slane %v68_v16, 7  ;;  %v82_v36 = vrot.slane %v80_v28, 7  ;;  %v2169_v42 = vld [vmem:[%s2675_s5 + $0x40] sm:$0xff]   ;;  %v2170_v44 = vld [vmem:[%s2675_s5 + $0x48] sm:$0xff]   ;;  %v2151_v45 = vld [vmem:[%s2671_s1 + $0x30] sm:$0xff]   ;;  %v89_v49 = vor.u32 %v87_v34, %v86_v33 }
   0xc   :  { %1893 = vmatprep.subr.bf16.mxu0 %v2138_v4  ;;  %1951 = vmatprep.subr.bf16.mxu1 %v2157_v15  ;;  %v335_v39 = vrot.slane %v333_v32, 1  ;;  %v2171_v46 = vld [vmem:[%s2675_s5 + $0x50] sm:$0xff]   ;;  %v2152_v47 = vld [vmem:[%s2671_s1 + $0x38] sm:$0xff]   ;;  %v2154_v48 = vld [vmem:[%s2671_s1 + $0x80] sm:$0xff]  }
   0xd   :  { %v78_v26 = vsel %vm66_vm0, %v70_v21, %v77_v22  ;;  %v2156_v51 = vld [vmem:[%s2671_s1 + $0x88] sm:$0xff]   ;;  %v90_v52 = vsel %vm66_vm0, %v82_v36, %v89_v49  ;;  %v2158_v54 = vld [vmem:[%s2671_s1 + $0x90] sm:$0xff]   ;;  %v2160_v55 = vld [vmem:[%s2671_s1 + $0x98] sm:$0xff]  }
   0xe   :  { %v336_v53 = vsel %vm324_vm1, %v331_v50, %v335_v39 }
   0xf   :  { %1894 = vmatpush3.bf16.msra.mxu0 %v2138_v4  ;;  %1952 = vmatpush3.bf16.msra.mxu1 %v2157_v15 }
  0x10   :  { %1895 = vmatprep.subr.bf16.mxu0 %v2139_v6  ;;  %1953 = vmatprep.subr.bf16.mxu1 %v2159_v18 }
  0x13   :  { %1896 = vmatpush3.bf16.msra.mxu0 %v2139_v6  ;;  %1954 = vmatpush3.bf16.msra.mxu1 %v2159_v18 }
  0x14   :  { %1897 = vmatprep.subr.bf16.mxu0 %v2140_v7  ;;  %1955 = vmatprep.subr.bf16.mxu1 %v2161_v23 }
  0x17   :  { %1898 = vmatpush3.bf16.msra.mxu0 %v2140_v7  ;;  %1956 = vmatpush3.bf16.msra.mxu1 %v2161_v23 }
  0x18   :  { %1899 = vmatprep.subr.bf16.mxu0 %v2141_v9  ;;  %1957 = vmatprep.subr.bf16.mxu1 %v2163_v29 }
  0x1b   :  { %1900 = vmatpush3.bf16.msra.mxu0 %v2141_v9  ;;  %1958 = vmatpush3.bf16.msra.mxu1 %v2163_v29 }
  0x1c   :  { %1901 = vmatprep.subr.bf16.mxu0 %v2142_v13  ;;  %1959 = vmatprep.subr.bf16.mxu1 %v2165_v37 }
  0x1f   :  { %1902 = vmatpush3.bf16.msra.mxu0 %v2142_v13  ;;  %1960 = vmatpush3.bf16.msra.mxu1 %v2165_v37 }
  0x20   :  { %1907 = vmatprep.subr.bf16.mxu0 %v2144_v19  ;;  %1961 = vmatprep.subr.bf16.mxu1 %v2167_v40 }
  0x22   :  { %1904 = vmatmul.mubr.bf16.vlgmr.msra.gmra.mrb[0].mxu0 %v2366_v20 }
  0x23   :  { %1908 = vmatpush3.bf16.msra.mxu0 %v2144_v19  ;;  %1923 = vmatprep.mubr.bf16.mxu0 %v78_v26 }
  0x24   :  { %1909 = vmatprep.subr.bf16.mxu0 %v2146_v25  ;;  %1962 = vmatpush3.bf16.msra.mxu1 %v2167_v40 }
  0x25   :  { %1967 = vmatprep.subr.bf16.mxu1 %v2169_v42 }
  0x27   :  { %1910 = vmatpush3.bf16.msra.mxu0 %v2146_v25  ;;  %1964 = vmatmul.mubr.bf16.vlgmr.msra.gmra.mrb[0].mxu1 %v2366_v20 }
  0x28   :  { %1911 = vmatprep.subr.bf16.mxu0 %v2147_v31  ;;  %1968 = vmatpush3.bf16.msra.mxu1 %v2169_v42 }
  0x29   :  { %1969 = vmatprep.subr.bf16.mxu1 %v2170_v44 }
  0x2b   :  { %1912 = vmatpush3.bf16.msra.mxu0 %v2147_v31 }
  0x2c   :  { %1913 = vmatprep.subr.bf16.mxu0 %v2148_v35  ;;  %1970 = vmatpush3.bf16.msra.mxu1 %v2170_v44 }
  0x2d   :  { %1971 = vmatprep.subr.bf16.mxu1 %v2171_v46 }
  0x2f   :  { %1914 = vmatpush3.bf16.msra.mxu0 %v2148_v35 }
  0x30   :  { %1915 = vmatprep.subr.bf16.mxu0 %v2149_v41  ;;  %1972 = vmatpush3.bf16.msra.mxu1 %v2171_v46 }
  0x33   :  { %1916 = vmatpush3.bf16.msra.mxu0 %v2149_v41 }
  0x34   :  { %1917 = vmatprep.subr.bf16.mxu0 %v2150_v43 }
  0x37   :  { %1918 = vmatpush3.bf16.msra.mxu0 %v2150_v43 }
  0x38   :  { %1919 = vmatprep.subr.bf16.mxu0 %v2151_v45 }
  0x3b   :  { %1920 = vmatpush3.bf16.msra.mxu0 %v2151_v45 }
  0x3c   :  { %1921 = vmatprep.subr.bf16.mxu0 %v2152_v47 }
  0x3f   :  { %1922 = vmatpush3.bf16.msra.mxu0 %v2152_v47 }
  0x40   :  { %1927 = vmatprep.subr.bf16.mxu0 %v2154_v48 }
  0x42   :  { %1924 = vmatmul.mubr.bf16.vlgmr.msra.gmra.mrb[0].mxu0 %v90_v52 }
  0x43   :  { %1928 = vmatpush3.bf16.msra.mxu0 %v2154_v48  ;;  %1943 = vmatprep.mubr.bf16.mxu0 %v336_v53 }
  0x44   :  { %1929 = vmatprep.subr.bf16.mxu0 %v2156_v51 }
  0x47   :  { %1930 = vmatpush3.bf16.msra.mxu0 %v2156_v51 }
  0x48   :  { %1931 = vmatprep.subr.bf16.mxu0 %v2158_v54 }
  0x49   :  { %16 = vsyncpa [#allocation4], 0  ;;  %v2162_v56 = vld [vmem:[%s2671_s1 + $0xa0] sm:$0xff]   ;;  %v2164_v57 = vld [vmem:[%s2671_s1 + $0xa8] sm:$0xff]   ;;  %v342_v60 = vrot.slane %v87_v34, 1  ;;  %vm620_vm2 = vcmask 1040384  }
  0x4a   :  { %v2166_v58 = vld [vmem:[%s2671_s1 + $0xb0] sm:$0xff]   ;;  %v323_v59 = vld [vmem:[#allocation2 + $0x28] sm:$0x1]  ;;  %v2168_v62 = vld [vmem:[%s2671_s1 + $0xb8] sm:$0xff]   ;;  %vm866_vm3 = vcmask 1046528   ;;  %vm1028_vm4 = vcmask 1041408  }
  0x4b   :  { %1932 = vmatpush3.bf16.msra.mxu0 %v2158_v54  ;;  %v345_v61 = vshll.u32 %v323_v59, 16  ;;  %v343_v63 = vor.u32 %v342_v60, %v84_v27  ;;  %v2172_v2 = vld [vmem:[%s2675_s5 + $0x58] sm:$0xff]   ;;  %v2173_v3 = vld [vmem:[%s2675_s5 + $0x60] sm:$0xff]   ;;  %v2174_v4 = vld [vmem:[%s2675_s5 + $0x68] sm:$0xff]   ;;  %vm1274_vm5 = vcmask 1045504   ;;  %vm2251_vm6 = vmmov 0  }
  0x4c   :  { %1933 = vmatprep.subr.bf16.mxu0 %v2160_v55  ;;  %1973 = vmatprep.subr.bf16.mxu1 %v2172_v2  ;;  %v2175_v5 = vld [vmem:[%s2675_s5 + $0x70] sm:$0xff]   ;;  %v2176_v6 = vld [vmem:[%s2675_s5 + $0x78] sm:$0xff]   ;;  %v2177_v7 = vld [vmem:[%s2675_s5] sm:$0xff]   ;;  %vm1480_vm7 = vcmask 1041409   ;;  %s2252_s21 = smov [#allocation3]  }
  0x4d   :  { %v347_v0 = vrot.slane %v345_v61, 1  ;;  %1974 = vmatpush3.bf16.msra.mxu1 %v2172_v2  ;;  %v2193_v8 = vld [vmem:[%s2677_s7 + $0x40] sm:$0xff]   ;;  %v2194_v9 = vld [vmem:[%s2677_s7 + $0x48] sm:$0xff]   ;;  %v2195_v10 = vld [vmem:[%s2677_s7 + $0x50] sm:$0xff]   ;;  %s1579_s22 = sshll.u32 %s2252_s21, 4  ;;  %s1580_s22 = int_to_ptr.vmem [resolvable:$true] %s1579_s22 }
  0x4e   :  { %1975 = vmatprep.subr.bf16.mxu1 %v2173_v3  ;;  %v1646_v15 = vld [vmem:[%s2674_s4] ss:$0 sm:$0xff]  ;;  %v2178_v39 = vld [vmem:[%s2675_s5 + $0x8] sm:$0xff]   ;;  %v612_v40 = vld [vmem:[#allocation2] sm:$0x80]  ;;  %s2225_s23 = scalar_lea.vmem %s1580_s22, 32  ;;  %p2230_p1 = scmp.lt.s32.totalorder %s1580_s22, %s1580_s22 }
  0x4f   :  { %1934 = vmatpush3.bf16.msra.mxu0 %v2160_v55  ;;  %v348_v1 = vsel %vm324_vm1, %v343_v63, %v347_v0  ;;  %v1645_v16 = vld [vmem:[%s2672_s2] ss:$0 sm:$0xff]  ;;  %v2179_v41 = vld [vmem:[%s2675_s5 + $0x10] sm:$0xff]   ;;  %v621_v42 = vrot.slane %v612_v40, 7  ;;  %v2180_v44 = vld [vmem:[%s2675_s5 + $0x18] sm:$0xff]   ;;  %p2226_p0 = scmp.ne.s32.totalorder %s1580_s22, %s2225_s23  ;;  %p2231_p2 = scmp.lt.s32.totalorder %s2225_s23, %s2225_s23 }
  0x50   :  { %1935 = vmatprep.subr.bf16.mxu0 %v2162_v56  ;;  %v2181_v47 = vld [vmem:[%s2675_s5 + $0x20] sm:$0xff]   ;;  %v2182_v48 = vld [vmem:[%s2675_s5 + $0x28] sm:$0xff]   ;;  %v2183_v49 = vld [vmem:[%s2675_s5 + $0x30] sm:$0xff]  }
  0x51   :  { %1976 = vmatpush3.bf16.msra.mxu1 %v2173_v3  ;;  %v2184_v50 = vld [vmem:[%s2675_s5 + $0x38] sm:$0xff]   ;;  %v859_v54 = vld [vmem:[#allocation2 + $0x10] sm:$0x1]  ;;  %v2185_v55 = vld [vmem:[%s2675_s5 + $0x80] sm:$0xff]   ;;  %p2232_p3 = por %p2231_p2, %p2230_p1 }
  0x52   :  { %1977 = vmatprep.subr.bf16.mxu1 %v2174_v4  ;;  %v614_v51 = vld [vmem:[#allocation2 + $0x18] sm:$0x80]  ;;  %v868_v59 = vrot.slane %v859_v54, 1  ;;  %v2186_v60 = vld [vmem:[%s2675_s5 + $0x88] sm:$0xff]   ;;  %v2187_v63 = vld [vmem:[%s2675_s5 + $0x90] sm:$0xff]  }
  0x53   :  { %1936 = vmatpush3.bf16.msra.mxu0 %v2162_v56  ;;  %v624_v56 = vrot.slane %v614_v51, 7  ;;  %v2188_v0 = vld [vmem:[%s2675_s5 + $0x98] sm:$0xff]   ;;  %v2190_v2 = vld [vmem:[%s2675_s5 + $0xa8] sm:$0xff]   ;;  %v2191_v3 = vld [vmem:[%s2675_s5 + $0xb0] sm:$0xff]   ;;  %p2233_p4 = pnand %p2232_p3, %p2226_p0 }
  0x54   :  { %1937 = vmatprep.subr.bf16.mxu0 %v2164_v57  ;;  %v1022_v51 = vld [vmem:[#allocation2 + $0x18] sm:$0xc0]  ;;  %v1267_v54 = vld [vmem:[#allocation2 + $0x10] sm:$0x3] }
  0x55   :  { %1978 = vmatpush3.bf16.msra.mxu1 %v2174_v4  ;;  %v2192_v4 = vld [vmem:[%s2675_s5 + $0xb8] sm:$0xff]  }
  0x56   :  { %1979 = vmatprep.subr.bf16.mxu1 %v2175_v5 }
  0x57   :  { %1938 = vmatpush3.bf16.msra.mxu0 %v2164_v57 }
  0x58   :  { %1939 = vmatprep.subr.bf16.mxu0 %v2166_v58 }
  0x59   :  { %1980 = vmatpush3.bf16.msra.mxu1 %v2175_v5 }
  0x5a   :  { %1981 = vmatprep.subr.bf16.mxu1 %v2176_v6 }
  0x5b   :  { %1940 = vmatpush3.bf16.msra.mxu0 %v2166_v58 }
  0x5c   :  { %1941 = vmatprep.subr.bf16.mxu0 %v2168_v62 }
  0x5d   :  { %1982 = vmatpush3.bf16.msra.mxu1 %v2176_v6  ;;  %v861_v6 = vld [vmem:[#allocation2 + $0x28] sm:$0x1] }
  0x5e   :  { %1987 = vmatprep.subr.bf16.mxu1 %v2177_v7 }
  0x5f   :  { %1942 = vmatpush3.bf16.msra.mxu0 %v2168_v62 }
  0x60   :  { %2027 = vmatprep.subr.bf16.mxu0 %v2193_v8 }
  0x62   :  { %1944 = vmatmul.mubr.bf16.vlgmr.msra.gmra.mrb[0].mxu0 %v348_v1  ;;  %v2189_v1 = vld [vmem:[%s2675_s5 + $0xa0] sm:$0xff]  }
  0x63   :  { %2028 = vmatpush3.bf16.msra.mxu0 %v2193_v8  ;;  %v871_v8 = vrot.slane %v861_v6, 1  ;;  %v1269_v6 = vld [vmem:[#allocation2 + $0x28] sm:$0x3] }
  0x64   :  { %2029 = vmatprep.subr.bf16.mxu0 %v2194_v9 }
  0x67   :  { %2030 = vmatpush3.bf16.msra.mxu0 %v2194_v9 }
  0x68   :  { %2031 = vmatprep.subr.bf16.mxu0 %v2195_v10 }
  0x6b   :  { %2032 = vmatpush3.bf16.msra.mxu0 %v2195_v10  ;;  %v2196_v10 = vld [vmem:[%s2677_s7 + $0x58] sm:$0xff]  }
  0x6c   :  { %2033 = vmatprep.subr.bf16.mxu0 %v2196_v10 }
  0x6f   :  { %2034 = vmatpush3.bf16.msra.mxu0 %v2196_v10  ;;  %v2217_v10 = vld [vmem:[%s2679_s9] sm:$0xff]  }
  0xfa   :  { %v1965_v11 = vpop.f32.mrb[0].mxu1 }
  0xfb   :  { %v589_v12 = vpop.f32.mrb[1].mxu1  ;;  %v598_v18 = vadd.f32 %v1965_v11, %v1646_v15  ;;  %v2197_v11 = vld [vmem:[%s2677_s7 + $0x60] sm:$0xff]  }
  0xfc   :  { %v1966_v13 = vpop.f32.mrb[2].mxu1  ;;  %v590_v21 = vadd.f32 %v1646_v15, %v589_v12  ;;  %2035 = vmatprep.subr.bf16.mxu0 %v2197_v11  ;;  %v2198_v12 = vld [vmem:[%s2677_s7 + $0x68] sm:$0xff]  }
  0xfd   :  { %v592_v14 = vpop.f32.mrb[3].mxu1  ;;  %v601_v30 = vadd.f32 %v1966_v13, %v1646_v15  ;;  %2036 = vmatpush3.bf16.msra.mxu0 %v2197_v11  ;;  %v2199_v13 = vld [vmem:[%s2677_s7 + $0x70] sm:$0xff]   ;;  %v2250_v11 = vmov 0.0  }
  0xfe   :  { %v593_v33 = vadd.f32 %v1646_v15, %v592_v14  ;;  %2037 = vmatprep.subr.bf16.mxu0 %v2198_v12  ;;  %v2200_v14 = vld [vmem:[%s2677_s7 + $0x78] sm:$0xff]   ;;  %v2201_v15 = vld [vmem:[%s2677_s7] sm:$0xff]  }
 0x101   :  { %2038 = vmatpush3.bf16.msra.mxu0 %v2198_v12  ;;  %v2218_v12 = vld [vmem:[%s2679_s9 + $0x8] sm:$0xff]  }
 0x102   :  { %2039 = vmatprep.subr.bf16.mxu0 %v2199_v13 }
 0x105   :  { %2040 = vmatpush3.bf16.msra.mxu0 %v2199_v13  ;;  %v2219_v13 = vld [vmem:[%s2679_s9 + $0x10] sm:$0xff]  }
 0x106   :  { %2041 = vmatprep.subr.bf16.mxu0 %v2200_v14 }
 0x109   :  { %2042 = vmatpush3.bf16.msra.mxu0 %v2200_v14  ;;  %v2220_v14 = vld [vmem:[%s2679_s9 + $0x18] sm:$0xff]  }
 0x10a   :  { %2047 = vmatprep.subr.bf16.mxu0 %v2201_v15 }
 0x135   :  { %v1945_v17 = vpop.f32.mrb[0].mxu0 }
 0x136   :  { %v478_v19 = vadd.f32 %v1945_v17, %v1645_v16  ;;  %v450_v20 = vpop.f32.mrb[1].mxu0 }
 0x137   :  { %v476_v22 = vadd.f32 %v1645_v16, %v450_v20  ;;  %v1946_v23 = vpop.f32.mrb[2].mxu0 }
 0x138   :  { %v482_v24 = vmax.f32 %v478_v19, 0.0  ;;  %v479_v25 = vadd.f32 %v1946_v23, %v1645_v16  ;;  %v453_v26 = vpop.f32.mrb[3].mxu0 }
 0x139   :  { %v480_v27 = vmax.f32 %v476_v22, 0.0  ;;  %v477_v28 = vadd.f32 %v1645_v16, %v453_v26  ;;  %v1711_v16 = vld [vmem:[%s2676_s6] ss:$0 sm:$0xff] }
 0x13a   :  { %v606_v29 = vadd.f32 %v598_v18, %v482_v24  ;;  %v483_v31 = vmax.f32 %v479_v25, 0.0 }
 0x13b   :  { %v604_v32 = vadd.f32 %v590_v21, %v480_v27  ;;  %v481_v34 = vmax.f32 %v477_v28, 0.0 }
 0x13c   :  { %v607_v35 = vadd.f32 %v601_v30, %v483_v31 }
 0x13d   :  { %v605_v36 = vadd.f32 %v593_v33, %v481_v34 }
 0x13e   :  { %v2485_v37 = vpack.c.bf16 %v607_v35, %v606_v29 }
 0x13f   :  { %v2487_v38 = vpack.c.bf16 %v605_v36, %v604_v32 }
 0x140   :  { %611 = vst [vmem:[#allocation2 + $0x20] sm:$0xff] %v2485_v37  ;;  %v1010_v23 = vunpack.c.l.bf16 %v2485_v37  ;;  %v1011_v31 = vunpack.c.h.bf16 %v2485_v37 }
 0x141   :  { %610 = vst [vmem:[#allocation2 + $0x8] sm:$0xff] %v2487_v38  ;;  %1983 = vmatprep.mubr.bf16.mxu1 %v2487_v38  ;;  %v1008_v27 = vunpack.c.l.bf16 %v2487_v38  ;;  %v1009_v34 = vunpack.c.h.bf16 %v2487_v38  ;;  %v2203_v38 = vld [vmem:[%s2677_s7 + $0x10] sm:$0xff]  }
 0x142   :  { %1984 = vmatmul.mubr.bf16.vlgmr.msra.gmra.mrb[4].mxu1 %v2485_v37  ;;  %v1020_v37 = vld [vmem:[#allocation2] sm:$0xc0] }
 0x143   :  { %1988 = vmatpush3.bf16.msra.mxu1 %v2177_v7 }
 0x144   :  { %1989 = vmatprep.subr.bf16.mxu1 %v2178_v39 }
 0x147   :  { %1990 = vmatpush3.bf16.msra.mxu1 %v2178_v39  ;;  %v615_v52 = vld [vmem:[#allocation2 + $0x20] sm:$0x7f] }
 0x148   :  { %v613_v43 = vld [vmem:[#allocation2 + $0x8] sm:$0x7f]  ;;  %1991 = vmatprep.subr.bf16.mxu1 %v2179_v41  ;;  %v625_v57 = vrot.slane %v615_v52, 7  ;;  %v860_v5 = vld [vmem:[#allocation2 + $0x20] sm:$0xfe] }
 0x149   :  { %v622_v45 = vrot.slane %v613_v43, 7  ;;  %v858_v53 = vld [vmem:[#allocation2 + $0x8] sm:$0xfe]  ;;  %v870_v7 = vrot.slane %v860_v5, 1 }
 0x14a   :  { %v867_v58 = vrot.slane %v858_v53, 1  ;;  %v626_v61 = vsel %vm620_vm2, %v624_v56, %v625_v57  ;;  %v1032_v56 = vrot.slane %v1022_v51, 6 }
 0x14b   :  { %v623_v46 = vsel %vm620_vm2, %v621_v42, %v622_v45  ;;  %1992 = vmatpush3.bf16.msra.mxu1 %v2179_v41  ;;  %v872_v9 = vsel %vm866_vm3, %v870_v7, %v871_v8  ;;  %v2202_v41 = vld [vmem:[%s2677_s7 + $0x8] sm:$0xff]   ;;  %v1029_v42 = vrot.slane %v1020_v37, 6  ;;  %v1279_v8 = vrot.slane %v1269_v6, 2 }
 0x14c   :  { %2003 = vmatprep.mubr.bf16.mxu1 %v623_v46  ;;  %1993 = vmatprep.subr.bf16.mxu1 %v2180_v44  ;;  %v869_v62 = vsel %vm866_vm3, %v867_v58, %v868_v59  ;;  %v1276_v59 = vrot.slane %v1267_v54, 2 }
 0x14f   :  { %1994 = vmatpush3.bf16.msra.mxu1 %v2180_v44  ;;  %v2204_v44 = vld [vmem:[%s2677_s7 + $0x18] sm:$0xff]  }
 0x150   :  { %1995 = vmatprep.subr.bf16.mxu1 %v2181_v47 }
 0x153   :  { %1996 = vmatpush3.bf16.msra.mxu1 %v2181_v47  ;;  %v2205_v47 = vld [vmem:[%s2677_s7 + $0x20] sm:$0xff]  }
 0x154   :  { %1997 = vmatprep.subr.bf16.mxu1 %v2182_v48 }
 0x157   :  { %1998 = vmatpush3.bf16.msra.mxu1 %v2182_v48  ;;  %v2206_v48 = vld [vmem:[%s2677_s7 + $0x28] sm:$0xff]  }
 0x158   :  { %1999 = vmatprep.subr.bf16.mxu1 %v2183_v49 }
 0x15b   :  { %2000 = vmatpush3.bf16.msra.mxu1 %v2183_v49  ;;  %v2207_v49 = vld [vmem:[%s2677_s7 + $0x30] sm:$0xff]  }
 0x15c   :  { %2001 = vmatprep.subr.bf16.mxu1 %v2184_v50 }
 0x15f   :  { %2002 = vmatpush3.bf16.msra.mxu1 %v2184_v50  ;;  %v2208_v50 = vld [vmem:[%s2677_s7 + $0x38] sm:$0xff]  }
 0x160   :  { %2007 = vmatprep.subr.bf16.mxu1 %v2185_v55 }
 0x162   :  { %2004 = vmatmul.mubr.bf16.vlgmr.msra.gmra.mrb[4].mxu1 %v626_v61 }
 0x163   :  { %2008 = vmatpush3.bf16.msra.mxu1 %v2185_v55  ;;  %2023 = vmatprep.mubr.bf16.mxu1 %v869_v62  ;;  %v2209_v55 = vld [vmem:[%s2677_s7 + $0x80] sm:$0xff]  }
 0x164   :  { %2009 = vmatprep.subr.bf16.mxu1 %v2186_v60 }
 0x167   :  { %2010 = vmatpush3.bf16.msra.mxu1 %v2186_v60  ;;  %v2210_v60 = vld [vmem:[%s2677_s7 + $0x88] sm:$0xff]  }
 0x168   :  { %2011 = vmatprep.subr.bf16.mxu1 %v2187_v63 }
 0x16b   :  { %2012 = vmatpush3.bf16.msra.mxu1 %v2187_v63  ;;  %v2211_v63 = vld [vmem:[%s2677_s7 + $0x90] sm:$0xff]  }
 0x16c   :  { %2013 = vmatprep.subr.bf16.mxu1 %v2188_v0 }
 0x16f   :  { %2014 = vmatpush3.bf16.msra.mxu1 %v2188_v0  ;;  %v2212_v0 = vld [vmem:[%s2677_s7 + $0x98] sm:$0xff]  }
 0x170   :  { %2015 = vmatprep.subr.bf16.mxu1 %v2189_v1 }
 0x173   :  { %2016 = vmatpush3.bf16.msra.mxu1 %v2189_v1  ;;  %v2213_v1 = vld [vmem:[%s2677_s7 + $0xa0] sm:$0xff]  }
 0x174   :  { %2017 = vmatprep.subr.bf16.mxu1 %v2190_v2 }
 0x177   :  { %2018 = vmatpush3.bf16.msra.mxu1 %v2190_v2  ;;  %v2214_v2 = vld [vmem:[%s2677_s7 + $0xa8] sm:$0xff]  }
 0x178   :  { %2019 = vmatprep.subr.bf16.mxu1 %v2191_v3 }
 0x17b   :  { %2020 = vmatpush3.bf16.msra.mxu1 %v2191_v3  ;;  %v2215_v3 = vld [vmem:[%s2677_s7 + $0xb0] sm:$0xff]  }
 0x17c   :  { %2021 = vmatprep.subr.bf16.mxu1 %v2192_v4 }
 0x17f   :  { %2022 = vmatpush3.bf16.msra.mxu1 %v2192_v4  ;;  %v2216_v4 = vld [vmem:[%s2677_s7 + $0xb8] sm:$0xff]  }
 0x180   :  { %2087 = vmatprep.subr.bf16.mxu1 %v2250_v11 }
 0x182   :  { %2024 = vmatmul.mubr.bf16.vlgmr.msra.gmra.mrb[4].mxu1 %v872_v9 }
 0x183   :  { %2088 = vmatpush3.bf16.msra.mxu1 %v2217_v10  ;;  %2103 = vmatprep.mubr.msk.bf16.mxu1 %vm2251_vm6, %v2250_v11 }
 0x184   :  { %2089 = vmatprep.subr.bf16.mxu1 %v2250_v11 }
 0x187   :  { %2090 = vmatpush3.bf16.msra.mxu1 %v2218_v12 }
 0x188   :  { %2091 = vmatprep.subr.bf16.mxu1 %v2250_v11 }
 0x18b   :  { %2092 = vmatpush3.bf16.msra.mxu1 %v2219_v13 }
 0x18c   :  { %2093 = vmatprep.subr.bf16.mxu1 %v2250_v11 }
 0x18f   :  { %2094 = vmatpush3.bf16.msra.mxu1 %v2220_v14 }
 0x190   :  { %2095 = vmatprep.subr.bf16.mxu1 %v2250_v11 }
 0x255   :  { %v2025_v17 = vpop.f32.mrb[4].mxu1 }
 0x256   :  { %v1002_v18 = vadd.f32 %v2025_v17, %v1711_v16  ;;  %v974_v19 = vpop.f32.mrb[5].mxu1  ;;  %v2223_v17 = vld [vmem:[%s2679_s9 + $0x30] sm:$0xff]  }
 0x257   :  { %v1000_v20 = vadd.f32 %v1711_v16, %v974_v19  ;;  %v2026_v21 = vpop.f32.mrb[6].mxu1  ;;  %v1768_v19 = vld [vmem:[%s2678_s8] ss:$0 sm:$0xff] }
 0x258   :  { %v1006_v22 = vmax.f32 %v1002_v18, 0.0  ;;  %v1003_v24 = vadd.f32 %v2026_v21, %v1711_v16  ;;  %v977_v25 = vpop.f32.mrb[7].mxu1  ;;  %v2224_v18 = vld [vmem:[%s2679_s9 + $0x38] sm:$0xff]  }
 0x259   :  { %v1004_v26 = vmax.f32 %v1000_v20, 0.0  ;;  %v1001_v28 = vadd.f32 %v1711_v16, %v977_v25  ;;  %v2222_v16 = vld [vmem:[%s2679_s9 + $0x28] sm:$0xff]  }
 0x25a   :  { %v1014_v29 = vadd.f32 %v1010_v23, %v1006_v22  ;;  %v1007_v30 = vmax.f32 %v1003_v24, 0.0 }
 0x25b   :  { %v1012_v32 = vadd.f32 %v1008_v27, %v1004_v26  ;;  %v1005_v33 = vmax.f32 %v1001_v28, 0.0 }
 0x25c   :  { %v1015_v35 = vadd.f32 %v1011_v31, %v1007_v30 }
 0x25d   :  { %v1013_v36 = vadd.f32 %v1009_v34, %v1005_v33 }
 0x25e   :  { %v2567_v39 = vpack.c.bf16 %v1015_v35, %v1014_v29 }
 0x25f   :  { %v2569_v40 = vpack.c.bf16 %v1013_v36, %v1012_v32 }
 0x260   :  { %1019 = vst [vmem:[#allocation2 + $0x20] sm:$0xff] %v2567_v39  ;;  %v1418_v26 = vunpack.c.l.bf16 %v2567_v39  ;;  %v1419_v34 = vunpack.c.h.bf16 %v2567_v39 }
 0x261   :  { %1018 = vst [vmem:[#allocation2 + $0x8] sm:$0xff] %v2569_v40  ;;  %2043 = vmatprep.mubr.bf16.mxu0 %v2569_v40  ;;  %v1416_v30 = vunpack.c.l.bf16 %v2569_v40 }
 0x262   :  { %2044 = vmatmul.mubr.bf16.vlgmr.msra.gmra.mrb[4].mxu0 %v2567_v39 }
 0x263   :  { %2048 = vmatpush3.bf16.msra.mxu0 %v2201_v15  ;;  %v2221_v15 = vld [vmem:[%s2679_s9 + $0x20] sm:$0xff]  }
 0x264   :  { %2049 = vmatprep.subr.bf16.mxu0 %v2202_v41  ;;  %2096 = vmatpush3.bf16.msra.mxu1 %v2221_v15 }
 0x265   :  { %2097 = vmatprep.subr.bf16.mxu1 %v2250_v11 }
 0x267   :  { %2050 = vmatpush3.bf16.msra.mxu0 %v2202_v41  ;;  %v1023_v52 = vld [vmem:[#allocation2 + $0x20] sm:$0x3f]  ;;  %v1417_v41 = vunpack.c.h.bf16 %v2569_v40 }
 0x268   :  { %v1021_v43 = vld [vmem:[#allocation2 + $0x8] sm:$0x3f]  ;;  %2051 = vmatprep.subr.bf16.mxu0 %v2203_v38  ;;  %v1033_v57 = vrot.slane %v1023_v52, 6  ;;  %v1268_v5 = vld [vmem:[#allocation2 + $0x20] sm:$0xfc]  ;;  %2098 = vmatpush3.bf16.msra.mxu1 %v2222_v16 }
 0x269   :  { %v1030_v45 = vrot.slane %v1021_v43, 6  ;;  %v1266_v53 = vld [vmem:[#allocation2 + $0x8] sm:$0xfc]  ;;  %v1278_v7 = vrot.slane %v1268_v5, 2  ;;  %2099 = vmatprep.subr.bf16.mxu1 %v2250_v11 }
 0x26a   :  { %v1275_v58 = vrot.slane %v1266_v53, 2  ;;  %v1034_v61 = vsel %vm1028_vm4, %v1032_v56, %v1033_v57 }
 0x26b   :  { %v1031_v46 = vsel %vm1028_vm4, %v1029_v42, %v1030_v45  ;;  %2052 = vmatpush3.bf16.msra.mxu0 %v2203_v38  ;;  %v1280_v9 = vsel %vm1274_vm5, %v1278_v7, %v1279_v8 }
 0x26c   :  { %2063 = vmatprep.mubr.bf16.mxu0 %v1031_v46  ;;  %2053 = vmatprep.subr.bf16.mxu0 %v2204_v44  ;;  %v1277_v62 = vsel %vm1274_vm5, %v1275_v58, %v1276_v59 }
 0x26d   :  { %2100 = vmatpush3.bf16.msra.mxu1 %v2223_v17 }
 0x26e   :  { %2101 = vmatprep.subr.bf16.mxu1 %v2250_v11 }
 0x26f   :  { %2054 = vmatpush3.bf16.msra.mxu0 %v2204_v44 }
 0x270   :  { %2055 = vmatprep.subr.bf16.mxu0 %v2205_v47 }
 0x271   :  { %2102 = vmatpush3.bf16.msra.mxu1 %v2224_v18 }
 0x273   :  { %2056 = vmatpush3.bf16.msra.mxu0 %v2205_v47 }
 0x274   :  { %2057 = vmatprep.subr.bf16.mxu0 %v2206_v48 }
 0x277   :  { %2058 = vmatpush3.bf16.msra.mxu0 %v2206_v48 }
 0x278   :  { %2059 = vmatprep.subr.bf16.mxu0 %v2207_v49 }
 0x27b   :  { %2060 = vmatpush3.bf16.msra.mxu0 %v2207_v49 }
 0x27c   :  { %2061 = vmatprep.subr.bf16.mxu0 %v2208_v50 }
 0x27f   :  { %2062 = vmatpush3.bf16.msra.mxu0 %v2208_v50 }
 0x280   :  { %2067 = vmatprep.subr.bf16.mxu0 %v2209_v55 }
 0x282   :  { %2064 = vmatmul.mubr.bf16.vlgmr.msra.gmra.mrb[4].mxu0 %v1034_v61 }
 0x283   :  { %2068 = vmatpush3.bf16.msra.mxu0 %v2209_v55  ;;  %2083 = vmatprep.mubr.bf16.mxu0 %v1277_v62 }
 0x284   :  { %2069 = vmatprep.subr.bf16.mxu0 %v2210_v60 }
 0x287   :  { %2070 = vmatpush3.bf16.msra.mxu0 %v2210_v60 }
 0x288   :  { %2071 = vmatprep.subr.bf16.mxu0 %v2211_v63 }
 0x28b   :  { %2072 = vmatpush3.bf16.msra.mxu0 %v2211_v63 }
 0x28c   :  { %2073 = vmatprep.subr.bf16.mxu0 %v2212_v0 }
 0x28f   :  { %2074 = vmatpush3.bf16.msra.mxu0 %v2212_v0 }
 0x290   :  { %2075 = vmatprep.subr.bf16.mxu0 %v2213_v1 }
 0x293   :  { %2076 = vmatpush3.bf16.msra.mxu0 %v2213_v1 }
 0x294   :  { %2077 = vmatprep.subr.bf16.mxu0 %v2214_v2 }
 0x297   :  { %2078 = vmatpush3.bf16.msra.mxu0 %v2214_v2 }
 0x298   :  { %2079 = vmatprep.subr.bf16.mxu0 %v2215_v3 }
 0x29b   :  { %2080 = vmatpush3.bf16.msra.mxu0 %v2215_v3 }
 0x29c   :  { %2081 = vmatprep.subr.bf16.mxu0 %v2216_v4 }
 0x29f   :  { %2082 = vmatpush3.bf16.msra.mxu0 %v2216_v4  ;;  %v1769_v4 = vld [vmem:[%s2680_s10] ss:$0 sm:$0xff] }
 0x2a2   :  { %2084 = vmatmul.mubr.bf16.vlgmr.msra.gmra.mrb[4].mxu0 %v1280_v9 }
 0x375   :  { %v2085_v20 = vpop.f32.mrb[4].mxu0 }
 0x376   :  { %v1410_v21 = vadd.f32 %v2085_v20, %v1768_v19  ;;  %v1382_v22 = vpop.f32.mrb[5].mxu0 }
 0x377   :  { %v1408_v23 = vadd.f32 %v1768_v19, %v1382_v22  ;;  %v2086_v24 = vpop.f32.mrb[6].mxu0 }
 0x378   :  { %v1414_v25 = vmax.f32 %v1410_v21, 0.0  ;;  %v1411_v27 = vadd.f32 %v2086_v24, %v1768_v19  ;;  %v1385_v28 = vpop.f32.mrb[7].mxu0 }
 0x379   :  { %v1412_v29 = vmax.f32 %v1408_v23, 0.0  ;;  %v1409_v31 = vadd.f32 %v1768_v19, %v1385_v28 }
 0x37a   :  { %v1422_v32 = vadd.f32 %v1418_v26, %v1414_v25  ;;  %v1415_v33 = vmax.f32 %v1411_v27, 0.0 }
 0x37b   :  { %v1420_v35 = vadd.f32 %v1416_v30, %v1412_v29  ;;  %v1413_v36 = vmax.f32 %v1409_v31, 0.0 }
 0x37c   :  { %v1423_v37 = vadd.f32 %v1419_v34, %v1415_v33 }
 0x37d   :  { %v1421_v38 = vadd.f32 %v1417_v41, %v1413_v36 }
 0x37e   :  { %v1425_v42 = vpack.c.bf16 %v1423_v37, %v1422_v32 }
 0x37f   :  { %v1424_v43 = vpack.c.bf16 %v1421_v38, %v1420_v35 }
 0x380   :  { %1427 = vst [vmem:[#allocation2 + $0x20] sm:$0xff] %v1425_v42  ;;  %v1432_v44 = vunpack.c.l.bf16 %v1425_v42  ;;  %v1433_v45 = vunpack.c.h.bf16 %v1425_v42 }
 0x381   :  { %1426 = vst [vmem:[#allocation2 + $0x8] sm:$0xff] %v1424_v43  ;;  %v1430_v46 = vunpack.c.l.bf16 %v1424_v43  ;;  %v1431_v47 = vunpack.c.h.bf16 %v1424_v43 }
 0x382   :  { %v1441_v48 = vadd.f32 %v1433_v45, %v1432_v44 }
 0x383   :  { %v1434_v49 = vadd.f32 %v1431_v47, %v1430_v46 }
 0x384   :  { %v1442_v50 = vrot.slane %v1441_v48, 4 }
 0x385   :  { %v1435_v51 = vrot.slane %v1434_v49, 4 }
 0x386   :  { %v1443_v52 = vadd.f32 %v1442_v50, %v1441_v48 }
 0x387   :  { %v1436_v39 = vadd.f32 %v1435_v51, %v1434_v49 }
 0x388   :  { %v1444_v53 = vrot.slane %v1443_v52, 2 }
 0x389   :  { %v1437_v54 = vrot.slane %v1436_v39, 2 }
 0x38a   :  { %v1445_v55 = vadd.f32 %v1444_v53, %v1443_v52 }
 0x38b   :  { %v1438_v40 = vadd.f32 %v1437_v54, %v1436_v39 }
 0x38c   :  { %v1446_v56 = vrot.slane %v1445_v55, 1 }
 0x38d   :  { %v1439_v57 = vrot.slane %v1438_v40, 1 }
 0x38e   :  { %v1447_v58 = vadd.f32 %v1446_v56, %v1445_v55 }
 0x38f   :  { %v1440_v59 = vadd.f32 %v1439_v57, %v1438_v40 }
 0x390   :  { %v1450_v60 = vmul.f32 0.0625, %v1447_v58 }
 0x391   :  { %v1449_v61 = vmul.f32 0.0625, %v1440_v59 }
 0x392   :  { %v1452_v62 = vpack.c.bf16 %v1450_v60, %v1450_v60 }
 0x393   :  { %v1451_v63 = vpack.c.bf16 %v1449_v61, %v1449_v61 }
 0x394   :  { %v1479_v0 = vunpack.c.l.b16 %v1452_v62 }
 0x395   :  { %v1478_v1 = vunpack.c.l.b16 %v1451_v63 }
 0x397   :  { %v1481_v2 = vsel %vm1480_vm7, %v1479_v0, %v1478_v1 }
 0x398   :  { %v1482_v3 = vpack.c.b16 %v1481_v2, %v1481_v2 }
 0x39a   :  { %2104 = vmatmul.mubr.bf16.vlgmr.msra.gmra.mrb[8].mxu1 %v1482_v3 }
 0x46d   :  { %v1566_v5 = vpop.f32.mrb[8].mxu1 }
 0x46e   :  { %v1567_v6 = vadd.f32 %v1769_v4, %v1566_v5  ;;  %v2105_v7 = vpop.f32.mrb[9].mxu1 }
 0x46f   :  { %v1569_v8 = vpop.f32.mrb[10].mxu1 }
 0x470   :  { %1572 = vst [vmem:[#allocation3] sm:$0x3] %v1567_v6  ;;  %v2106_v9 = vpop.f32.mrb[11].mxu1 }
 0x471   :  { %2236 = shalt.err (!%p2233_p4)
}
 0x472   :  { %s2237_s10 = scalar_lea.hbm %s2681_s11, 32 }
 0x473   :  { %p2238_p5 = scmp.ne.s32.totalorder %s2681_s11, %s2237_s10  ;;  %p2241_p6 = scmp.lt.u32.totalorder %s2237_s10, %s2681_s11 }
 0x475   :  { %p2243_p7 = pnand %p2241_p6, %p2238_p5 }
 0x477   :  { %2246 = shalt.err (!%p2243_p7)
}
 0x478   :  { %1582 = dma.vmem_to_hbm [thread:$0]  %s1580_s22, 32, %s2681_s11, [#allocation4]  }
 0x479   :  { %2247 = dma.done.wait [#allocation4], 32  }
 0x47a   :  { %2248 = vsyncadd [#allocation4], 4294967264 }
 0x47b   :  { %1586 = vsyncpa [#allocation4], 1 }

</bundles_post_ra>
